<compile_context>
chip_gen: v7x
topology: tpu7x:2x2x1
jax: 0.10.0
libtpu: 0.0.40
codegen_flags: <defaults>
</compile_context>

<pallas_src>
import functools

import jax
import jax.numpy as jnp
from jax.experimental import pallas as pl
from jax.experimental.pallas import tpu as pltpu


def _round_up(x, m):
    return ((x + m - 1) // m) * m


def _cdiv(a, b):
    return -(-a // b)


def _focal_partial_kernel(x_ref, t_ref, out_ref, *, hw):
    """One (bn, C, THW) logits tile -> (2, 128) partial: [sum of CE ; valid count]."""
    x = x_ref[...].astype(jnp.float32)            # (bn, c, thw), upcast in VMEM
    t = t_ref[...]                                # (bn, 1, thw) int32 targets (-1 = ignore)
    bn, c, thw = x.shape

    # log-softmax over the class (sublane) axis.
    m = jnp.max(x, axis=1, keepdims=True)                        # (bn, 1, thw)
    z = x - m
    lse = jnp.log(jnp.sum(jnp.exp(z), axis=1, keepdims=True))    # (bn, 1, thw)

    # Gather z[target] per pixel: small (1, C, 1) class-id iota broadcast against t.
    class_ids = jax.lax.broadcasted_iota(jnp.int32, (1, c, 1), 1)
    onehot = class_ids == t                                       # (bn, c, thw)
    picked_z = jnp.sum(jnp.where(onehot, z, 0.0), axis=1, keepdims=True)  # (bn, 1, thw)

    # Tail-lane mask: the grid over-runs the unpadded spatial axis on the last block.
    lane = pl.program_id(1) * thw + jax.lax.broadcasted_iota(jnp.int32, (1, 1, thw), 2)
    valid = (t != -1) & (lane < hw)                               # (bn, 1, thw)

    # where (not *) so garbage tail logits (possible Inf/NaN lse) never leak into the sum.
    loss = jnp.where(valid, lse - picked_z, 0.0)

    s_loss = jnp.sum(loss)
    s_cnt = jnp.sum(valid.astype(jnp.float32))

    # Lane-dense (2, 128) partial block: row 0 = loss sum, row 1 = valid count.
    row_ids = jax.lax.broadcasted_iota(jnp.int32, (2, 128), 0)
    out_ref[...] = jnp.where(row_ids == 0, s_loss, s_cnt)


def focal_loss(inputs, targets, *, alpha=1.0, gamma=2.0, reduce=True,
               block_bytes=6 * 1024 * 1024, min_grid_steps=8):
    """inputs: (N, C, *spatial) float logits; targets: (N, *spatial) int, -1 ignored."""
    n, c = inputs.shape[0], inputs.shape[1]
    hw = 1
    for d in inputs.shape[2:]:
        hw *= d

    # NCHW consumed directly (contiguous reshapes only; keep original dtype).
    x = inputs.reshape(n, c, hw)
    t = targets.reshape(n, 1, hw).astype(jnp.int32)
    itemsize = jnp.dtype(x.dtype).itemsize

    # ---- spatial tiling: lanes budgeted by the f32 working-set per block -------------
    hw128 = _round_up(hw, 128)
    lane_budget = max(128, ((block_bytes // max(c * 4, 1)) // 128) * 128)
    thw = min(lane_budget, hw128)
    num_tiles = _cdiv(hw, thw)
    thw = _round_up(_cdiv(hw, num_tiles), 128)        # rebalance -> near-equal tiles
    num_tiles = _cdiv(hw, thw)

    # Keep at least `min_grid_steps` grid steps (both TensorCores + pipeline overlap).
    max_tiles = _cdiv(hw, 128)
    if n * num_tiles < min_grid_steps and num_tiles < max_tiles:
        want = min(max_tiles, max(num_tiles, _cdiv(min_grid_steps, n)))
        thw = _round_up(_cdiv(hw, want), 128)
        num_tiles = _cdiv(hw, thw)

    # ---- batch grouping for tiny-hw shapes so each step still moves a big block ------
    bn = 1
    per_row_bytes = c * thw * itemsize
    for cand in range(2, n + 1):
        if n % cand:
            continue
        if cand * per_row_bytes > block_bytes:
            break
        if (n // cand) * num_tiles < min_grid_steps:
            break
        bn = cand

    # ---- VMEM budget: double-buffered DMA blocks + f32 intermediates + slack ---------
    in_block = bn * c * thw * itemsize
    tgt_block = bn * thw * 4
    f32_block = bn * c * thw * 4
    vmem_limit = 2 * (in_block + tgt_block) + 4 * f32_block + (6 << 20)
    vmem_limit = int(min(max(vmem_limit, 24 << 20), 100 << 20))

    kernel = functools.partial(_focal_partial_kernel, hw=hw)
    partials = pl.pallas_call(
        kernel,
        out_shape=jax.ShapeDtypeStruct((n // bn, num_tiles, 2, 128), jnp.float32),
        grid=(n // bn, num_tiles),
        in_specs=[
            pl.BlockSpec((bn, c, thw), lambda i, j: (i, 0, j)),
            pl.BlockSpec((bn, 1, thw), lambda i, j: (i, 0, j)),
        ],
        out_specs=pl.BlockSpec((None, None, 2, 128), lambda i, j: (i, j, 0, 0)),
        compiler_params=pltpu.CompilerParams(
            dimension_semantics=("parallel", "parallel"),
            vmem_limit_bytes=vmem_limit,
        ),
    )(x, t)

    # Final (trivial) stage in JAX: mean CE over non-ignored pixels + focal transform.
    total_loss = jnp.sum(partials[:, :, 0, 0])
    total_cnt = jnp.sum(partials[:, :, 1, 0])
    bce = total_loss / total_cnt          # NaN if every target is -1, matching torch
    pt = jnp.exp(-bce)
    f_loss = alpha * (1.0 - pt) ** gamma * bce
    # reduce=True applies torch.mean to an already-scalar value -> identity.
    return f_loss


def _focal_loss_ref(inputs, targets, alpha=1.0, gamma=2.0):
    c = inputs.shape[1]
    perm = (0,) + tuple(range(2, inputs.ndim)) + (1,)
    x = jnp.transpose(inputs, perm).reshape(-1, c).astype(jnp.float32)
    t = targets.reshape(-1).astype(jnp.int32)
    logp = jax.nn.log_softmax(x, axis=-1)
    valid = t != -1
    picked = jnp.take_along_axis(logp, jnp.where(valid, t, 0)[:, None], axis=1)[:, 0]
    ce = jnp.sum(jnp.where(valid, -picked, 0.0)) / jnp.sum(valid.astype(jnp.float32))
    pt = jnp.exp(-ce)
    return alpha * (1.0 - pt) ** gamma * ce


if __name__ == "__main__":
    key = jax.random.PRNGKey(0)
    k1, k2, k3, k4 = jax.random.split(key, 4)

    # Segmentation-style shape (spatial size a multiple of 128 once flattened).
    N, C, H, W = 2, 4, 16, 16
    inputs = jax.random.normal(k1, (N, C, H, W), dtype=jnp.float32)
    # class indices in [-1, C): include some ignored (-1) pixels
    targets = jax.random.randint(k2, (N, H, W), minval=-1, maxval=C, dtype=jnp.int32)
    out = jax.block_until_ready(focal_loss(inputs, targets, alpha=1.0, gamma=2.0, reduce=True))
    ref = _focal_loss_ref(inputs, targets, alpha=1.0, gamma=2.0)
    assert jnp.allclose(out, ref, rtol=1e-4, atol=1e-5), (out, ref)

    # Odd spatial size: exercises the unpadded tail-lane masking path (no jnp.pad copy).
    N2, C2, H2, W2 = 2, 3, 9, 13
    inputs2 = jax.random.normal(k3, (N2, C2, H2, W2), dtype=jnp.float32)
    targets2 = jax.random.randint(k4, (N2, H2, W2), minval=-1, maxval=C2, dtype=jnp.int32)
    out2 = jax.block_until_ready(focal_loss(inputs2, targets2))
    ref2 = _focal_loss_ref(inputs2, targets2)
    assert jnp.allclose(out2, ref2, rtol=1e-4, atol=1e-5), (out2, ref2)

    print("KERNEL_OK")
</pallas_src>

<mosaic_0001>
module attributes {stable_mosaic.version = 11 : i64} {
  func.func @_focal_partial_kernel(%arg0: i32, %arg1: i32, %arg2: memref<1x4x128xf32, #tpu.memory_space<vmem>>, %arg3: memref<1x1x128xi32, #tpu.memory_space<vmem>>, %arg4: memref<1x1x2x128xf32, #tpu.memory_space<vmem>>) attributes {dimension_semantics = [#tpu.dimension_semantics<parallel>, #tpu.dimension_semantics<parallel>], iteration_bounds = array<i64: 2, 2>, scalar_prefetch = 0 : i64, scratch_operands = 0 : i64, tpu.core_type = #tpu.core_type<tc>, window_params = [{transform_indices = @transform_0, window_bounds = array<i64: 1, 4, 128>}, {transform_indices = @transform_1, window_bounds = array<i64: 1, 1, 128>}, {transform_indices = @transform_2, window_bounds = array<i64: 1, 1, 2, 128>}]} {
    %c0 = arith.constant 0 : index
    %c0_0 = arith.constant 0 : index
    %c0_1 = arith.constant 0 : index
    %0 = vector.load %arg2[%c0, %c0_0, %c0_1] : memref<1x4x128xf32, #tpu.memory_space<vmem>>, vector<1x4x128xf32>
    %c0_2 = arith.constant 0 : index
    %c0_3 = arith.constant 0 : index
    %c0_4 = arith.constant 0 : index
    %1 = vector.load %arg3[%c0_2, %c0_3, %c0_4] : memref<1x1x128xi32, #tpu.memory_space<vmem>>, vector<1x1x128xi32>
    %cst = arith.constant dense<0xFF800000> : vector<1x128xf32>
    %2 = vector.multi_reduction <maximumf>, %0, %cst [1] : vector<1x4x128xf32> to vector<1x128xf32>
    %3 = vector.shape_cast %2 : vector<1x128xf32> to vector<1x1x128xf32>
    %4 = vector.broadcast %3 : vector<1x1x128xf32> to vector<1x4x128xf32>
    %5 = arith.subf %0, %4 : vector<1x4x128xf32>
    %6 = math.exp %5 : vector<1x4x128xf32>
    %cst_5 = arith.constant dense<0.000000e+00> : vector<1x128xf32>
    %7 = vector.multi_reduction <add>, %6, %cst_5 [1] : vector<1x4x128xf32> to vector<1x128xf32>
    %8 = vector.shape_cast %7 : vector<1x128xf32> to vector<1x1x128xf32>
    %9 = math.log %8 : vector<1x1x128xf32>
    %10 = tpu.iota {dimensions = array<i32: 1>} : vector<1x4x1xi32>
    %11 = vector.broadcast %10 : vector<1x4x1xi32> to vector<1x4x128xi32>
    %12 = vector.broadcast %1 : vector<1x1x128xi32> to vector<1x4x128xi32>
    %13 = arith.cmpi eq, %11, %12 : vector<1x4x128xi32>
    %cst_6 = arith.constant 0.000000e+00 : f32
    %14 = vector.broadcast %cst_6 : f32 to vector<1x4x128xf32>
    %15 = arith.select %13, %5, %14 : vector<1x4x128xi1>, vector<1x4x128xf32>
    %cst_7 = arith.constant dense<0.000000e+00> : vector<1x128xf32>
    %16 = vector.multi_reduction <add>, %15, %cst_7 [1] : vector<1x4x128xf32> to vector<1x128xf32>
    %17 = vector.shape_cast %16 : vector<1x128xf32> to vector<1x1x128xf32>
    %c128_i32 = arith.constant 128 : i32
    %18 = arith.muli %arg1, %c128_i32 : i32
    %19 = tpu.iota {dimensions = array<i32: 2>} : vector<1x1x128xi32>
    %20 = vector.broadcast %18 : i32 to vector<1x1x128xi32>
    %21 = arith.addi %20, %19 : vector<1x1x128xi32>
    %c-1_i32 = arith.constant -1 : i32
    %22 = vector.broadcast %c-1_i32 : i32 to vector<1x1x128xi32>
    %23 = arith.cmpi ne, %1, %22 : vector<1x1x128xi32>
    %c256_i32 = arith.constant 256 : i32
    %24 = vector.broadcast %c256_i32 : i32 to vector<1x1x128xi32>
    %25 = arith.cmpi slt, %21, %24 : vector<1x1x128xi32>
    %26 = arith.andi %23, %25 : vector<1x1x128xi1>
    %27 = arith.subf %9, %17 : vector<1x1x128xf32>
    %cst_8 = arith.constant 0.000000e+00 : f32
    %28 = vector.broadcast %cst_8 : f32 to vector<1x1x128xf32>
    %29 = arith.select %26, %27, %28 : vector<1x1x128xi1>, vector<1x1x128xf32>
    %30 = vector.shape_cast %29 : vector<1x1x128xf32> to vector<1x1x1x128xf32>
    %cst_9 = arith.constant dense<0.000000e+00> : vector<1xf32>
    %31 = vector.multi_reduction <add>, %30, %cst_9 [1, 2, 3] : vector<1x1x1x128xf32> to vector<1xf32>
    %32 = vector.shape_cast %31 : vector<1xf32> to vector<1x1x1x1xf32>
    %33 = vector.extract %32[0, 0, 0, 0] : f32 from vector<1x1x1x1xf32>
    %34 = arith.extui %26 : vector<1x1x128xi1> to vector<1x1x128xi32>
    %35 = arith.sitofp %34 : vector<1x1x128xi32> to vector<1x1x128xf32>
    %36 = vector.shape_cast %35 : vector<1x1x128xf32> to vector<1x1x1x128xf32>
    %cst_10 = arith.constant dense<0.000000e+00> : vector<1xf32>
    %37 = vector.multi_reduction <add>, %36, %cst_10 [1, 2, 3] : vector<1x1x1x128xf32> to vector<1xf32>
    %38 = vector.shape_cast %37 : vector<1xf32> to vector<1x1x1x1xf32>
    %39 = vector.extract %38[0, 0, 0, 0] : f32 from vector<1x1x1x1xf32>
    %40 = tpu.iota {dimensions = array<i32: 0>} : vector<2x128xi32>
    %c0_i32 = arith.constant 0 : i32
    %41 = vector.broadcast %c0_i32 : i32 to vector<2x128xi32>
    %42 = arith.cmpi eq, %40, %41 : vector<2x128xi32>
    %43 = vector.broadcast %33 : f32 to vector<2x128xf32>
    %44 = vector.broadcast %39 : f32 to vector<2x128xf32>
    %45 = arith.select %42, %43, %44 : vector<2x128xi1>, vector<2x128xf32>
    %c0_11 = arith.constant 0 : index
    %c0_12 = arith.constant 0 : index
    %c0_13 = arith.constant 0 : index
    %c0_14 = arith.constant 0 : index
    %46 = vector.load %arg4[%c0_11, %c0_12, %c0_13, %c0_14] : memref<1x1x2x128xf32, #tpu.memory_space<vmem>>, vector<1x1x2x128xf32>
    %47 = vector.shape_cast %46 : vector<1x1x2x128xf32> to vector<2x128xf32>
    %48 = vector.shape_cast %45 : vector<2x128xf32> to vector<1x1x2x128xf32>
    tpu.vector_store %arg4[%c0_11, %c0_12, %c0_13, %c0_14], %48 {strides = array<i32>} : memref<1x1x2x128xf32, #tpu.memory_space<vmem>>, vector<1x1x2x128xf32>,
    return
  }
  func.func @transform_0(%arg0: i32, %arg1: i32) -> (i32, i32, i32) {
    %c0_i32 = arith.constant 0 : i32
    %c0_i32_0 = arith.constant 0 : i32
    return %arg0, %c0_i32, %arg1 : i32, i32, i32
  }
  func.func @transform_1(%arg0: i32, %arg1: i32) -> (i32, i32, i32) {
    %c0_i32 = arith.constant 0 : i32
    %c0_i32_0 = arith.constant 0 : i32
    return %arg0, %c0_i32, %arg1 : i32, i32, i32
  }
  func.func @transform_2(%arg0: i32, %arg1: i32) -> (i32, i32, i32, i32) {
    %c0_i32 = arith.constant 0 : i32
    %c0_i32_0 = arith.constant 0 : i32
    %c0_i32_1 = arith.constant 0 : i32
    return %arg0, %arg1, %c0_i32, %c0_i32_0 : i32, i32, i32, i32
  }
}

</mosaic_0001>

<bundles_post_ra>
// kernel: tpu_custom_call.1
= control target key start
LH: loop header
LB: loop body
LE: loop exit
PB: predicated region body
PF: predicated region fallthrough
CT: control target
= control target key end

     0   :  { %7 = vsyncpa [#allocation3], 0  ;;  %s957_s0 = inlined_call_operand.hbm [shape: f32[2,4,256], index: 0, kind: input, shape index: {}]   ;;  %s958_s1 = inlined_call_operand.hbm [shape: s32[2,1,256], index: 1, kind: input, shape index: {}]   ;;  %s959_s2 = inlined_call_operand.hbm [shape: f32[2,2,2,128], index: 2, kind: output, shape index: {}]  }
   0x1   :  { %9 = vsyncpa [#allocation3 + $0x1], 0 }
   0x2   :  { %10 = vsyncpa [#allocation6], 0 }
   0x3   :  { %12 = vsyncpa [#allocation6 + $0x1], 0 }
   0x4   :  { %13 = vsyncpa [#allocation4], 0 }
   0x5   :  { %15 = vsyncpa [#allocation4 + $0x1], 0  ;;  %s707_s9 = smov 0   ;;  %s709_s10 = smov 0  }
   0x6   :  { %s711_s11 = smov 0   ;;  %s713_s12 = smov 0  }
   0x7   :  { %s715_s13 = smov 0   ;;  %s717_s14 = smov 0  }
   0x8   :  { %s719_s15 = smov 0   ;;  %s721_s16 = smov 0  }
   0x9 LB: > { %s413_s17 = sadd.s32 4294967295, %s686_s16   ;;  %s414_s18 = sadd.s32 4294967294, %s686_s16   ;;  %s686_s16 = sphi %s721_s16, %s21_s16   ;;  %s682_s15 = sphi %s719_s15, %s980_s15   ;;  %s678_s14 = sphi %s717_s14, %s979_s14   ;;  %s674_s13 = sphi %s715_s13, %s978_s13   ;;  %s670_s12 = sphi %s713_s12, %s977_s12   ;;  %s666_s11 = sphi %s711_s11, %s976_s11   ;;  %s662_s10 = sphi %s709_s10, %s975_s10   ;;  %s658_s9 = sphi %s707_s9, %s974_s9  }
   0xa   : > { %s30_s19 = sadd.s32 1, %s678_s14  ;;  %s33_s20 = sadd.s32 1, %s682_s15 }
   0xb   : > { %p31_p0 = scmp.ge.s32.totalorder %s30_s19, 2  ;;  %s42_s21 = sadd.s32 1, %s666_s11 }
   0xc   : > { %p49_p1 = scmp.ne.s32.totalorder %s666_s11, %s662_s10  ;;  %p50_p2 = scmp.eq.s32.totalorder %s686_s16, 0 }
   0xd   : > { %s982_s19 = smov (%p31_p0, %s30_s19), 0  ;;  %s984_s20 = smov (!%p31_p0, %s33_s20), %s682_s15 }
   0xe   : > { %s38_s22 = ssub.s32 %s678_s14, %s982_s19  ;;  %p760_p3 = por %p50_p2, %p49_p1 }
   0xf   : > { %p35_p4 = scmp.ge.s32.totalorder %s984_s20, 2  ;;  %p55_p5 = scmp.ne.s32.totalorder %s662_s10, %s658_s9 }
  0x10   : > { %p56_p6 = scmp.eq.s32.totalorder %s413_s17, 0  ;;  %p109_p7 = scmp.eq.s32.totalorder %s413_s17, 3 }
  0x11   : > { %s986_s20 = smov (%p35_p4, %s984_s20), 0  ;;  %p115_p10 = scmp.eq.s32.totalorder %s414_s18, 3 }
  0x12   : > { %p768_p8 = por %p56_p6, %p55_p5  ;;  %p772_p9 = por %p109_p7, %p49_p1 }
  0x13   : > { %s37_s26 = ssub.s32 %s682_s15, %s986_s20  ;;  %p778_p12 = por %p115_p10, %p55_p5 }
  0x14   : > { %s963_s24 = scalar_select %p768_p8, 1, 0 }
  0x15   : > { %s964_s25 = scalar_select %p772_p9, 1, 0 }
  0x16   : > { %s39_s27 = sor.u32 %s38_s22, %s37_s26  ;;  %p453_p13 = scmp.lt.s32.totalorder %s686_s16, 4 }
  0x17   : > { %p40_p11 = scmp.eq.s32.totalorder %s39_s27, 0  ;;  %s784_s29 = sand.u32 1, %s666_s11  }
  0x18   : > { %s965_s28 = scalar_select %p778_p12, 1, 0 }
  0x19   : > { %s787_s30 = scalar_select %p40_p11, %s666_s11, %s42_s21  }
  0x1a   : > { %s417_s3 = sshll.u32 %s784_s29, 2  ;;  %s418_s4 = sshll.u32 %s682_s15, 1 }
  0x1b   : > { %s792_s5 = sadd.s32 %s678_s14, %s418_s4  ;;  %s139_s6 = scalar_lea.vmem [#allocation2], %s417_s3 }
  0x1c   : > { %s148_s7 = sshll.u32 %s139_s6, 4  ;;  %s419_s8 = sshll.u32 %s792_s5, 6  ;;  %s795_s7 = int_to_ptr.vmem [resolvable:$true] %s148_s7 }
  0x1d   : > { %s800_s22 = scalar_lea.hbm %s957_s0, %s419_s8  ;;  %p804_p0 = pnand %p453_p13, %p760_p3 }
  0x1e   : > { %s136_s26 = scalar_lea.sflag [#allocation3], %s784_s29  ;;  %s524_s27 = scalar_lea.hbm %s800_s22, 64 }
  0x1f   : > { %p525_p4 = scmp.ne.s32.totalorder %s800_s22, %s524_s27  ;;  %p526_p5 = pneg %p804_p0 }
  0x20   : > { %s529_s4 = scalar_lea.hbm %s957_s0, 256  ;;  %p530_p3 = scmp.lt.u32.totalorder %s800_s22, %s957_s0 }
  0x21   : > { %p527_p6 = pnand %p526_p5, %p525_p4  ;;  %p531_p10 = scmp.lt.u32.totalorder %s529_s4, %s524_s27 }
  0x22   : > { %p533_p13 = scmp.lt.u32.totalorder %s524_s27, %s800_s22 }
  0x23   : > { %p528_p7 = pneg %p527_p6  ;;  %p532_p11 = por %p531_p10, %p530_p3 }
  0x25   : > { %p534_p1 = por %p533_p13, %p532_p11 }
  0x27   : > { %p535_p2 = pnand %p534_p1, %p528_p7 }
  0x29   : > { %538 = shalt.err (!%p535_p2)
}
  0x2a   : > { %s539_s17 = scalar_lea.vmem %s795_s7, 64  ;;  %s688_s18 = smov [#allocation2]  }
  0x2b   : > { %p540_p4 = scmp.ne.s32.totalorder %s795_s7, %s539_s17  ;;  %s544_s23 = sshll.u32 %s688_s18, 4  ;;  %s545_s23 = int_to_ptr.vmem [resolvable:$false] %s544_s23 }
  0x2c   : > { %s546_s3 = scalar_lea.vmem %s545_s23, 128  ;;  %p547_p9 = scmp.lt.s32.totalorder %s795_s7, %s545_s23 }
  0x2d   : > { %p542_p6 = pnand %p540_p4, %p526_p5  ;;  %p548_p3 = scmp.lt.s32.totalorder %s546_s3, %s539_s17 }
  0x2f   : > { %p543_p12 = pneg %p542_p6  ;;  %p549_p10 = por %p548_p3, %p547_p9 }
  0x31   : > { %p550_p11 = pnand %p549_p10, %p543_p12 }
  0x33   : > { %553 = shalt.err (!%p550_p11)
}
  0x34   : > { %445 = dma.hbm_to_vmem [thread:$0]  (!%p804_p0), %s800_s22, 64, %s795_s7, %s136_s26  }
  0x35   : > { %p967_p1 = scmp.lt.s32.totalorder %s686_s16, 5  ;;  %p968_p2 = scmp.ge.s32.totalorder %s686_s16, 1 }
  0x36   : > { %s421_s4 = sshll.u32 %s792_s5, 4  ;;  %s158_s6 = scalar_lea.vmem [#allocation5], %s784_s29 }
  0x37   : > { %p840_p7 = pnand %p968_p2, %p967_p1  ;;  %s167_s8 = sshll.u32 %s158_s6, 4  ;;  %s168_s8 = int_to_ptr.vmem [resolvable:$true] %s167_s8 }
  0x38   : > { %s849_s23 = scalar_lea.hbm %s958_s1, %s421_s4  ;;  %s156_s7 = scalar_lea.sflag [#allocation6], %s784_s29 }
  0x39   : > { %s969_s27 = scalar_select %p840_p7, 1, 0 }
  0x3a   : > { %s554_s22 = scalar_lea.hbm %s849_s23, 16  ;;  %s559_s3 = scalar_lea.hbm %s958_s1, 64 }
  0x3b   : > { %p555_p9 = scmp.ne.s32.totalorder %s849_s23, %s554_s22  ;;  %p560_p4 = scmp.lt.u32.totalorder %s849_s23, %s958_s1 }
  0x3c   : > { %p561_p6 = scmp.lt.u32.totalorder %s559_s3, %s554_s22  ;;  %p563_p10 = scmp.lt.u32.totalorder %s554_s22, %s849_s23 }
  0x3d   : > { %p557_p12 = pnand %p555_p9, %p526_p5 }
  0x3e   : > { %p562_p3 = por %p561_p6, %p560_p4 }
  0x3f   : > { %p558_p13 = pneg %p557_p12 }
  0x40   : > { %p564_p11 = por %p563_p10, %p562_p3 }
  0x42   : > { %p565_p1 = pnand %p564_p11, %p558_p13 }
  0x44   : > { %568 = shalt.err (!%p565_p1)
}
  0x45   : > { %s569_s29 = scalar_lea.vmem %s168_s8, 16  ;;  %s689_s4 = smov [#allocation5]  }
  0x46   : > { %p570_p2 = scmp.ne.s32.totalorder %s168_s8, %s569_s29  ;;  %s574_s18 = sshll.u32 %s689_s4, 4  ;;  %s575_s18 = int_to_ptr.vmem [resolvable:$false] %s574_s18 }
  0x47   : > { %s576_s5 = scalar_lea.vmem %s575_s18, 32  ;;  %p577_p8 = scmp.lt.s32.totalorder %s168_s8, %s575_s18 }
  0x48   : > { %p572_p9 = pnand %p570_p2, %p526_p5  ;;  %p578_p7 = scmp.lt.s32.totalorder %s576_s5, %s569_s29 }
  0x4a   : > { %p573_p12 = pneg %p572_p9  ;;  %p579_p4 = por %p578_p7, %p577_p8 }
  0x4c   : > { %p580_p6 = pnand %p579_p4, %p573_p12 }
  0x4e   : > { %583 = shalt.err (!%p580_p6)
}
  0x4f   : > { %448 = dma.hbm_to_vmem [thread:$0]  (!%p804_p0), %s849_s23, 16, %s168_s8, %s156_s7  }
  0x50   : > { %p970_p13 = scmp.ne.s32.totalorder %s969_s27, 0 }
  0x51   : > { %s874_s22 = sand.u32 (!%p970_p13), 1, %s662_s10   ;;  %p971_p5 = scmp.ne.s32.totalorder (!%p970_p13), %s963_s24, 0 }
  0x52   : > { %176 = sbr.rel (%p970_p13) target bundleno = 375 (0x177), region = 28  ;;  %s423_s26 = sshll.u32 (!%p970_p13), %s874_s22, 2 }
  0x53   : > { %s179_s3 = scalar_lea.sflag (!%p970_p13), [#allocation3], %s874_s22  ;;  %s182_s6 = scalar_lea.vmem (!%p970_p13), [#allocation2], %s423_s26 }
  0x59   : > { %645 = dma.done.wait (%p971_p5), %s179_s3, 64  }
  0x5a   : > { %647 = vsyncadd (%p971_p5), %s179_s3, 4294967232  ;;  %s188_s21 = scalar_lea.sflag [#allocation6], %s874_s22  ;;  %s190_s27 = scalar_lea.vmem [#allocation5], %s874_s22 }
  0x5b   : > { %649 = dma.done.wait (%p971_p5), %s188_s21, 16  }
  0x5c   : > { %651 = vsyncadd (%p971_p5), %s188_s21, 4294967280  ;;  %vm217_vm0 = vcmask 1043456   ;;  %v215_v0 = vld [vmem:[%s182_s6] sm:$0xf]  ;;  %v237_v5 = vlaneseq  ;;  %s425_s24 = sshll.u32 %s670_s12, 7  ;;  %vm262_vm5 = vcmask 1040384  }
  0x5d   : > { %v218_v1 = vsel %vm217_vm0, %v215_v0, -inf  ;;  %v216_v12 = vld [vmem:[%s190_s27] sm:$0x1]  ;;  %v255_v30 = vstv %s425_s24  ;;  %v690_v38 = vmov 0.0   ;;  %s428_s8 = sshll.u32 %s674_s13, 1  ;;  %s424_s23 = sshll.u32 %s874_s22, 1 }
  0x5e   : > { %v219_v2 = vrot.slane %v218_v1, 4  ;;  %v889_v8 = vshrl.u32 %v237_v5, 7  ;;  %v254_v29 = vand.u32 127, %v237_v5  ;;  %vm257_vm2 = vcmp.ne.s32.totalorder %v216_v12, 4294967295  ;;  %s302_s7 = sadd.s32 %s670_s12, %s428_s8  ;;  %s214_s4 = scalar_lea.vmem [#allocation7], %s424_s23 }
  0x5f   : > { %s429_s17 = sshll.u32 %s302_s7, 5  ;;  %s306_s18 = sshll.u32 %s214_s4, 4  ;;  %s905_s18 = int_to_ptr.vmem [resolvable:$true] %s306_s18 }
  0x60   : > { %v220_v3 = vmax.f32 %v218_v1, %v219_v2  ;;  %v241_v11 = vsub.s32 0, %v889_v8  ;;  %v256_v32 = vadd.s32 %v255_v30, %v254_v29  ;;  %vm285_vm6 = vcmp.eq.s32.totalorder %v889_v8, 0  ;;  %s903_s6 = scalar_lea.hbm %s959_s2, %s429_s17  ;;  %s291_s12 = scalar_lea.sflag [#allocation4], %s874_s22 }
  0x61   : > { %s584_s13 = scalar_lea.vmem %s905_s18, 32  ;;  %p972_p0 = scmp.ne.s32.totalorder %s964_s25, 0 }
  0x62   : > { %v221_v4 = vrot.slane %v220_v3, 2  ;;  %v242_v14 = vrot.slane %v216_v12, %v241_v11  ;;  %vm258_vm3 = vcmp.lt.s32.totalorder %v256_v32, 256  ;;  %p585_p8 = scmp.ne.s32.totalorder %s905_s18, %s584_s13  ;;  %s691_s21 = smov [#allocation7]  }
  0x63   : > { %vm259_vm4 = vmand %vm257_vm2, %vm258_vm3  ;;  %s588_s27 = sshll.u32 %s691_s21, 4  ;;  %s589_s27 = int_to_ptr.vmem [resolvable:$false] %s588_s27 }
  0x64   : > { %v222_v6 = vmax.f32 %v220_v3, %v221_v4  ;;  %vm243_vm1 = vcmp.eq.s32.totalorder %v889_v8, %v242_v14  ;;  %v426_v39 = vsel %vm259_vm4, 1.0, %v690_v38  ;;  %p586_p7 = pnand %p585_p8, %p972_p0  ;;  %s590_s24 = scalar_lea.vmem %s589_s27, 64 }
  0x65   : > { %v275_v41 = vsel %vm262_vm5, %v426_v39, 0.0  ;;  %p591_p10 = scmp.lt.s32.totalorder %s905_s18, %s589_s27  ;;  %p592_p11 = scmp.lt.s32.totalorder %s590_s24, %s584_s13 }
  0x66   : > { %v223_v7 = vrot.slane %v222_v6, 1  ;;  %p587_p3 = pneg %p586_p7 }
  0x67   : > { %p593_p1 = por %p592_p11, %p591_p10 }
  0x68   : > { %v224_v9 = vmax.f32 %v222_v6, %v223_v7 }
  0x69   : > { %p594_p2 = pnand %p593_p1, %p587_p3 }
  0x6a   : > { %v225_v10 = vsub.f32 %v215_v0, %v224_v9 }
  0x6c   : > { %v226_v13 = vmul.f32 1.442695, %v225_v10  ;;  %v244_v15 = vsel %vm243_vm1, %v225_v10, 0.0 }
  0x6d   : > { %v245_v17 = vsel %vm217_vm0, %v244_v15, 0.0 }
  0x6e   : > { %520 = vpow2.f32 %v226_v13  ;;  %v246_v20 = vrot.slane %v245_v17, 4 }
  0x70   : > { %v247_v23 = vadd.f32 %v246_v20, %v245_v17 }
  0x72   : > { %v248_v26 = vrot.slane %v247_v23, 2 }
  0x74   : > { %v249_v28 = vadd.f32 %v248_v26, %v247_v23 }
  0x76   : > { %v250_v31 = vrot.slane %v249_v28, 1 }
  0x78   : > { %v521_v16 = vpop.eup %520  ;;  %v251_v33 = vadd.f32 %v250_v31, %v249_v28 }
  0x79   : > { %v228_v18 = vsel %vm217_vm0, %v521_v16, 0.0 }
  0x7a   : > { %v229_v19 = vrot.slane %v228_v18, 4 }
  0x7c   : > { %v230_v21 = vadd.f32 %v229_v19, %v228_v18 }
  0x7e   : > { %v231_v22 = vrot.slane %v230_v21, 2 }
  0x80   : > { %v232_v24 = vadd.f32 %v231_v22, %v230_v21 }
  0x82   : > { %v233_v25 = vrot.slane %v232_v24, 1 }
  0x84   : > { %v234_v27 = vadd.f32 %v233_v25, %v232_v24 }
  0x86   : > { %522 = vlog2.f32 %v234_v27 }
  0x90   : > { %v523_v34 = vpop.eup %522 }
  0x91   : > { %v236_v35 = vmul.f32 0.6931472, %v523_v34 }
  0x93   : > { %v260_v36 = vsub.f32 %v236_v35, %v251_v33 }
  0x95   : > { %v261_v37 = vsel %vm259_vm4, %v260_v36, 0.0 }
  0x96   : > { %v263_v40 = vsel %vm262_vm5, %v261_v37, 0.0 }
  0x97   : > { %264 = vadd.xlane.f32.xlu0 %v263_v40 }
  0x9b   : > { %276 = vadd.xlane.f32.xlu0 %v275_v41 }
 0x124   : > { %v265_v42 = vpop.xlane.xlu0 %264 }
 0x125   : > { %v266_v43 = vrot.slane %v265_v42, 4 }
 0x127   : > { %v267_v44 = vadd.f32 %v266_v43, %v265_v42 }
 0x128   : > { %v277_v45 = vpop.xlane.xlu0 %276 }
 0x129   : > { %v268_v46 = vrot.slane %v267_v44, 2  ;;  %v278_v47 = vrot.slane %v277_v45, 4 }
 0x12b   : > { %v279_v48 = vadd.f32 %v278_v47, %v277_v45  ;;  %v269_v49 = vadd.f32 %v268_v46, %v267_v44 }
 0x12d   : > { %v280_v50 = vrot.slane %v279_v48, 2  ;;  %v270_v51 = vrot.slane %v269_v49, 1 }
 0x12f   : > { %v281_v52 = vadd.f32 %v280_v50, %v279_v48  ;;  %v271_v53 = vadd.f32 %v270_v51, %v269_v49 }
 0x131   : > { %432 = vpush %v271_v53  ;;  %v282_v54 = vrot.slane %v281_v52, 1 }
 0x133   : > { %v283_v55 = vadd.f32 %v282_v54, %v281_v52 }
 0x135   : > { %434 = vpush %v283_v55 }
 0x162   : > { %s433_s29 = spop %432 }
 0x163   : > { %v286_v56 = vstv %s433_s29 }
 0x166   : > { %s435_s5 = spop %434 }
 0x167   : > { %v287_v57 = vstv %s435_s5 }
 0x168   : > { %v288_v58 = vsel %vm285_vm6, %v286_v56, %v287_v57 }
 0x169   : > { %289 = vst [vmem:[%s214_s4] sm:$0x3] %v288_v58 }
 0x16a   : > { %597 = shalt.err (!%p594_p2)
}
 0x16b   : > { %s598_s22 = scalar_lea.hbm %s903_s6, 32  ;;  %s602_s7 = scalar_lea.hbm %s959_s2, 128 }
 0x16c   : > { %p599_p9 = scmp.ne.s32.totalorder %s903_s6, %s598_s22  ;;  %p603_p6 = scmp.lt.u32.totalorder %s903_s6, %s959_s2 }
 0x16d   : > { %p604_p13 = scmp.lt.u32.totalorder %s602_s7, %s598_s22  ;;  %p606_p8 = scmp.lt.u32.totalorder %s598_s22, %s903_s6 }
 0x16e   : > { %p600_p12 = pnand %p599_p9, %p972_p0 }
 0x16f   : > { %p605_p5 = por %p604_p13, %p603_p6 }
 0x170   : > { %p601_p4 = pneg %p600_p12 }
 0x171   : > { %p607_p7 = por %p606_p8, %p605_p5 }
 0x173   : > { %p608_p3 = pnand %p607_p7, %p601_p4 }
 0x175   : > { %611 = shalt.err (!%p608_p3)
}
 0x176   : > { %440 = dma.vmem_to_hbm [thread:$0]  (%p972_p0), %s905_s18, 32, %s903_s6, %s291_s12  }
 0x177 PF: > { %p454_p10 = scmp.ge.s32.totalorder %s686_s16, 2  ;;  %s318_s4 = sand.u32 1, %s658_s9  }
 0x178   : > { %p973_p11 = scmp.ne.s32.totalorder %s965_s28, 0  ;;  %s319_s5 = scalar_lea.sflag [#allocation4], %s318_s4 }
 0x17a   : > { %p450_p1 = pnand %p454_p10, %p973_p11 }
 0x17c   : > { %653 = dma.done.wait (!%p450_p1), %s319_s5, 32  }
 0x17d   : > { %655 = vsyncadd (!%p450_p1), %s319_s5, 4294967264  ;;  %s21_s16 = sadd.s32 1, %s686_s16   ;;  %s974_s9 = smov %s662_s10 }
 0x17e   : > { %p18_p2 = scmp.ge.s32.totalorder %s21_s16, 6   ;;  %s975_s10 = smov %s666_s11 }
 0x17f   : > { %s976_s11 = smov %s787_s30  ;;  %s977_s12 = smov %s678_s14 }
 0x180   : > { %s978_s13 = smov %s682_s15  ;;  %s979_s14 = smov %s982_s19 }
 0x181   : > { %s980_s15 = smov %s986_s20  ;;  %20 = sbr.rel (!%p18_p2) target bundleno = 9 (0x9), region = 86 }
 0x188   :  { %324 = vsyncpa [#allocation3], 1 }
 0x189   :  { %326 = vsyncpa [#allocation3 + $0x1], 1 }
 0x18a   :  { %327 = vsyncpa [#allocation6], 1 }
 0x18b   :  { %329 = vsyncpa [#allocation6 + $0x1], 1 }
 0x18c   :  { %330 = vsyncpa [#allocation4], 1 }
 0x18d   :  { %332 = vsyncpa [#allocation4 + $0x1], 1 }

</bundles_post_ra>
